<compile_context>
chip_gen: v7x
topology: tpu7x:2x2x1
jax: 0.10.0
libtpu: 0.0.40
codegen_flags: <defaults>
</compile_context>

<pallas_src>
import math
import functools

import jax
import jax.numpy as jnp
from jax.experimental import pallas as pl
from jax.experimental.pallas import tpu as pltpu


_LANE = 128
_MiB = 1024 * 1024


def _round_up(x, m):
    return (x + m - 1) // m * m


def _cdiv(a, b):
    return (a + b - 1) // b


def _vmem_budget_bytes():
    """Per-TensorCore VMEM budget we are willing to ask Mosaic for."""
    kind = ""
    try:
        kind = jax.devices()[0].device_kind.lower()
    except Exception:
        pass
    if "v7" in kind:
        return 48 * _MiB   # 64 MiB physical per TC -> leave headroom
    if "v5" in kind or "v6" in kind:
        return 96 * _MiB   # 128 MiB physical -> allows a fully resident W2
    return 48 * _MiB       # conservative default for unknown generations


def _largest_tile_divisor(total, want, step=_LANE):
    """Largest multiple of `step` that divides `total` and is <= max(want, step)."""
    want = max(want, step)
    best = step
    cand = step
    while cand <= total:
        if total % cand == 0 and cand <= want:
            best = cand
        cand += step
    return best


def _plan_vmem_bytes(tm, tn, d_in, dh_p, do_p, x_it, w_it, h_it, o_it, w2_resident):
    """Estimated kernel VMEM use (bytes) for a candidate tiling."""
    total = d_in * dh_p * w_it          # W1 (resident, single-buffered)
    total += dh_p * 4                   # b1 (f32, single-buffered)
    total += 2 * tm * d_in * x_it       # x row tile (double-buffered)
    total += tm * dh_p * h_it           # h scratch
    total += 2 * tm * tn * o_it         # output tile (double-buffered)
    if w2_resident:
        total += dh_p * do_p * w_it     # W2 fully resident (single-buffered)
        total += do_p * 4               # b2
    else:
        total += 2 * dh_p * tn * w_it   # W2 column tile (double-buffered)
        total += 2 * tn * 4             # b2 tile
    return total


def _adapter_kernel(x_ref, w1_ref, b1_ref, w2_ref, b2_ref, o_ref, h_ref):
    # x_ref : (tm, D_in)   input row tile (matmul dtype, no in-kernel upcast)
    # w1_ref: (D_in, Dh_p) full W1 (resident across the whole grid)
    # b1_ref: (1, Dh_p)    f32
    # w2_ref: (Dh_p, tn)   column tile of W2 (or all of W2 when resident)
    # b2_ref: (1, tn)      f32
    # o_ref : (tm, tn)
    # h_ref : (tm, Dh_p)   VMEM scratch (W2's dtype) holding GELU(x @ W1 + b1)
    j = pl.program_id(1)

    # Hidden activations depend only on the row tile -> compute once per i.
    @pl.when(j == 0)
    def _():
        h = jnp.dot(x_ref[...], w1_ref[...], preferred_element_type=jnp.float32)
        h = h + b1_ref[...]
        # Exact (erf) GELU in f32, matching torch.nn.GELU() default.
        h = 0.5 * h * (1.0 + jax.lax.erf(h * jnp.float32(1.0 / math.sqrt(2.0))))
        h_ref[...] = h.astype(h_ref.dtype)

    # linear2 on this output-column tile, f32 accumulation on the MXU.
    out = jnp.dot(h_ref[...], w2_ref[...], preferred_element_type=jnp.float32)
    out = out + b2_ref[...]
    o_ref[...] = out.astype(o_ref.dtype)


def prepare_image_adapter_params(w1, b1, w2, b2, *, param_dtype=jnp.bfloat16):
    """Pad and cast the adapter weights ONCE (at init, outside the jitted path).

    Weights are [in_features, out_features]. Feature dims are zero-padded to
    multiples of 128 so the kernel output stays lane-dense; padded hidden
    columns are exactly 0 (GELU(0) = 0) and padded W2 rows are 0, so they
    contribute nothing. Biases stay in f32 (added to f32 accumulators).
    Store weights in bf16 for full MXU rate; f32 also works (slower path).
    """
    d_in, d_hid = w1.shape
    if w2.shape[0] != d_hid:
        raise ValueError(
            f"w2.shape[0]={w2.shape[0]} must equal w1.shape[1]={d_hid}")
    d_out = w2.shape[1]

    dh_p = _round_up(d_hid, _LANE)
    do_p = _round_up(d_out, _LANE)

    w1p = jnp.pad(w1, ((0, 0), (0, dh_p - d_hid))).astype(param_dtype)
    b1p = jnp.pad(b1, (0, dh_p - d_hid)).astype(jnp.float32).reshape(1, dh_p)
    w2p = jnp.pad(w2, ((0, dh_p - d_hid), (0, do_p - d_out))).astype(param_dtype)
    b2p = jnp.pad(b2, (0, do_p - d_out)).astype(jnp.float32).reshape(1, do_p)
    return w1p, b1p, w2p, b2p, d_out


@functools.partial(jax.jit, static_argnames=("d_out", "tm", "tn"))
def image_adapter_forward(vision_outputs, w1p, b1p, w2p, b2p, *, d_out,
                          tm=512, tn=512):
    """vision_outputs: [B, S, D_in]  ->  [B, S, d_out]."""
    B, S, d_in = vision_outputs.shape
    dh_p = w1p.shape[1]
    do_p = w2p.shape[1]
    M = B * S

    x2d = vision_outputs.reshape(M, d_in)
    # Both MXU operands must share the low-precision dtype: cast x down to the
    # weights' dtype when weights are 16-bit (avoids the slow mixed/f32 path).
    if jnp.dtype(w1p.dtype).itemsize == 2 and x2d.dtype != w1p.dtype:
        x2d = x2d.astype(w1p.dtype)

    out_dtype = vision_outputs.dtype
    x_it = jnp.dtype(x2d.dtype).itemsize
    w_it = jnp.dtype(w1p.dtype).itemsize
    h_it = jnp.dtype(w2p.dtype).itemsize
    o_it = jnp.dtype(out_dtype).itemsize

    # Sublane packing: bf16 packs 16 rows per vreg, f32 packs 8.
    sub = 16 if x_it == 2 else 8

    # --- row tile -------------------------------------------------------------
    tm_eff = min(tm, _round_up(M, sub))
    # Force >= 2 row tiles when M is big enough to split, so the "parallel" row
    # axis can shard across TensorCores (v7x has 2 TCs per chip).
    if _round_up(M, tm_eff) // tm_eff == 1 and M >= 2 * _LANE:
        tm_eff = _round_up(_cdiv(M, 2), sub)

    # --- fit the plan into the per-generation VMEM budget ----------------------
    budget = _vmem_budget_bytes()
    margin = 8 * _MiB  # headroom for Mosaic internal scratch / semaphores
    usable = budget - margin

    tm_candidates = []
    t = tm_eff
    while True:
        tm_candidates.append(t)
        nxt = max(sub, _round_up(t // 2, sub))
        if nxt == t:
            break
        t = nxt

    tn_tiled = _largest_tile_divisor(do_p, tn)

    plan = None
    # Prefer a fully resident W2 (read from HBM once, instead of once per row
    # tile), as long as it does not force a tiny row tile.
    for tm_c in tm_candidates:
        if tm_c < min(tm_eff, 256):
            break
        if _plan_vmem_bytes(tm_c, do_p, d_in, dh_p, do_p,
                            x_it, w_it, h_it, o_it, True) <= usable:
            plan = (tm_c, do_p, True)
            break
    if plan is None:
        for tm_c in tm_candidates:
            if _plan_vmem_bytes(tm_c, tn_tiled, d_in, dh_p, do_p,
                                x_it, w_it, h_it, o_it, False) <= usable:
                plan = (tm_c, tn_tiled, False)
                break
    if plan is None:  # best effort: smallest row tile, column-tiled W2
        plan = (tm_candidates[-1], tn_tiled, False)

    tm_eff, tn_eff, w2_resident = plan
    M_pad = _round_up(M, tm_eff)
    if M_pad != M:
        x2d = jnp.pad(x2d, ((0, M_pad - M), (0, 0)))

    grid = (M_pad // tm_eff, do_p // tn_eff)

    vmem_used = _plan_vmem_bytes(tm_eff, tn_eff, d_in, dh_p, do_p,
                                 x_it, w_it, h_it, o_it, w2_resident)
    vmem_limit = int(min(budget, vmem_used + margin))

    # Single-buffer inputs whose block index never changes (no wasted VMEM).
    resident = pl.Buffered(1)
    if w2_resident:
        w2_spec = pl.BlockSpec((dh_p, tn_eff), lambda i, j: (0, j),
                               pipeline_mode=resident)
        b2_spec = pl.BlockSpec((1, tn_eff), lambda i, j: (0, j),
                               pipeline_mode=resident)
    else:
        w2_spec = pl.BlockSpec((dh_p, tn_eff), lambda i, j: (0, j))
        b2_spec = pl.BlockSpec((1, tn_eff), lambda i, j: (0, j))

    cost = pl.CostEstimate(
        flops=2 * M_pad * dh_p * d_in + 2 * M_pad * do_p * dh_p,
        transcendentals=M_pad * dh_p,  # erf
        bytes_accessed=(M_pad * d_in * x_it + d_in * dh_p * w_it
                        + dh_p * do_p * w_it + dh_p * 4 + do_p * 4
                        + M_pad * do_p * o_it),
    )

    out2d = pl.pallas_call(
        _adapter_kernel,
        out_shape=jax.ShapeDtypeStruct((M_pad, do_p), out_dtype),
        grid_spec=pltpu.PrefetchScalarGridSpec(
            num_scalar_prefetch=0,
            grid=grid,
            in_specs=[
                pl.BlockSpec((tm_eff, d_in), lambda i, j: (i, 0)),   # x row tile
                pl.BlockSpec((d_in, dh_p), lambda i, j: (0, 0),
                             pipeline_mode=resident),                # W1 (resident)
                pl.BlockSpec((1, dh_p), lambda i, j: (0, 0),
                             pipeline_mode=resident),                # b1
                w2_spec,                                             # W2
                b2_spec,                                             # b2
            ],
            out_specs=pl.BlockSpec((tm_eff, tn_eff), lambda i, j: (i, j)),
            scratch_shapes=[pltpu.VMEM((tm_eff, dh_p), w2p.dtype)],  # h scratch
        ),
        compiler_params=pltpu.CompilerParams(
            # Row tiles shard across TensorCores; the output-column axis must
            # stay serial per row tile because the h scratch is reused across it.
            dimension_semantics=("parallel", "arbitrary"),
            vmem_limit_bytes=vmem_limit,
        ),
        cost_estimate=cost,
    )(x2d, w1p, b1p, w2p, b2p)

    return out2d[:M, :d_out].reshape(B, S, d_out)


def _reference(x, w1, b1, w2, b2):
    h = x.astype(jnp.float32) @ w1.astype(jnp.float32) + b1.astype(jnp.float32)
    h = 0.5 * h * (1.0 + jax.lax.erf(h / jnp.sqrt(jnp.float32(2.0))))
    return h @ w2.astype(jnp.float32) + b2.astype(jnp.float32)


if __name__ == "__main__":
    # Small shapes consistent with the module: [B, S, input_features].
    # D_out = 192 intentionally exercises the lane-padding path (-> 256).
    B, S = 2, 8
    input_features, output_features = 256, 192

    key = jax.random.PRNGKey(0)
    kx, k1, kb1, k2, kb2 = jax.random.split(key, 5)

    x = jax.random.normal(kx, (B, S, input_features), dtype=jnp.float32)

    # Deterministic parameter init (PyTorch-style uniform bounds), stored as
    # [in, out] so the kernel computes x @ W + b.
    bound1 = 1.0 / math.sqrt(input_features)
    w1 = jax.random.uniform(k1, (input_features, output_features),
                            minval=-bound1, maxval=bound1, dtype=jnp.float32)
    b1 = jax.random.uniform(kb1, (output_features,),
                            minval=-bound1, maxval=bound1, dtype=jnp.float32)

    bound2 = 1.0 / math.sqrt(output_features)
    w2 = jax.random.uniform(k2, (output_features, output_features),
                            minval=-bound2, maxval=bound2, dtype=jnp.float32)
    b2 = jax.random.uniform(kb2, (output_features,),
                            minval=-bound2, maxval=bound2, dtype=jnp.float32)

    ref = _reference(x.reshape(B * S, input_features), w1, b1, w2, b2)
    ref = ref.reshape(B, S, output_features)

    # f32 weights: exact-path check (tight tolerance).
    w1p, b1p, w2p, b2p, d_out = prepare_image_adapter_params(
        w1, b1, w2, b2, param_dtype=jnp.float32)
    out_f32 = image_adapter_forward(x, w1p, b1p, w2p, b2p, d_out=d_out)
    out_f32 = jax.block_until_ready(out_f32)
    assert out_f32.shape == (B, S, output_features)
    assert jnp.allclose(out_f32, ref, atol=1e-4, rtol=1e-4), "f32 mismatch vs reference"

    # bf16 weights + bf16 x: full-rate MXU path (f32 accumulation), looser tol.
    w1b, b1b, w2b, b2b, d_out = prepare_image_adapter_params(
        w1, b1, w2, b2, param_dtype=jnp.bfloat16)
    out_bf16 = image_adapter_forward(x, w1b, b1b, w2b, b2b, d_out=d_out)
    out_bf16 = jax.block_until_ready(out_bf16)
    assert out_bf16.shape == (B, S, output_features)
    assert jnp.allclose(out_bf16.astype(jnp.float32), ref,
                        atol=3e-2, rtol=3e-2), "bf16 mismatch vs reference"

    print("KERNEL_OK")
</pallas_src>

<mosaic_0001>
module attributes {stable_mosaic.version = 11 : i64} {
  func.func @_adapter_kernel(%arg0: i32, %arg1: i32, %arg2: memref<16x256xf32, #tpu.memory_space<vmem>>, %arg3: memref<256x256xf32, #tpu.memory_space<vmem>>, %arg4: memref<1x256xf32, #tpu.memory_space<vmem>>, %arg5: memref<256x256xf32, #tpu.memory_space<vmem>>, %arg6: memref<1x256xf32, #tpu.memory_space<vmem>>, %arg7: memref<16x256xf32, #tpu.memory_space<vmem>>, %arg8: memref<16x256xf32, #tpu.memory_space<vmem>>) attributes {dimension_semantics = [#tpu.dimension_semantics<parallel>, #tpu.dimension_semantics<arbitrary>], iteration_bounds = array<i64: 1, 1>, scalar_prefetch = 0 : i64, scratch_operands = 1 : i64, tpu.core_type = #tpu.core_type<tc>, window_params = [{transform_indices = @transform_0, window_bounds = array<i64: 16, 256>}, {pipeline_mode = #tpu.pipeline_mode<synchronous>, transform_indices = @transform_1, window_bounds = array<i64: 256, 256>}, {pipeline_mode = #tpu.pipeline_mode<synchronous>, transform_indices = @transform_2, window_bounds = array<i64: 1, 256>}, {pipeline_mode = #tpu.pipeline_mode<synchronous>, transform_indices = @transform_3, window_bounds = array<i64: 256, 256>}, {pipeline_mode = #tpu.pipeline_mode<synchronous>, transform_indices = @transform_4, window_bounds = array<i64: 1, 256>}, {transform_indices = @transform_5, window_bounds = array<i64: 16, 256>}]} {
    %c0_i32 = arith.constant 0 : i32
    %0 = arith.cmpi eq, %arg1, %c0_i32 : i32
    %1 = arith.extui %0 : i1 to i32
    %c0_i32_0 = arith.constant 0 : i32
    %2 = arith.cmpi ne, %1, %c0_i32_0 : i32
    scf.if %2 {
      %c0_8 = arith.constant 0 : index
      %c0_9 = arith.constant 0 : index
      %10 = vector.load %arg2[%c0_8, %c0_9] : memref<16x256xf32, #tpu.memory_space<vmem>>, vector<16x256xf32>
      %c0_10 = arith.constant 0 : index
      %c0_11 = arith.constant 0 : index
      %11 = vector.load %arg3[%c0_10, %c0_11] : memref<256x256xf32, #tpu.memory_space<vmem>>, vector<256x256xf32>
      %cst_12 = arith.constant dense<0.000000e+00> : vector<16x256xf32>
      %12 = tpu.matmul %10, %11, %cst_12 {dimension_numbers = #tpu.dot_dimension_numbers<[1], [0], [0], [1], [0, 0, 1, 1], [], []>} : vector<16x256xf32>, vector<256x256xf32>, vector<16x256xf32> -> vector<16x256xf32>
      %c0_13 = arith.constant 0 : index
      %c0_14 = arith.constant 0 : index
      %13 = vector.load %arg4[%c0_13, %c0_14] : memref<1x256xf32, #tpu.memory_space<vmem>>, vector<1x256xf32>
      %14 = vector.broadcast %13 : vector<1x256xf32> to vector<16x256xf32>
      %15 = arith.addf %12, %14 : vector<16x256xf32>
      %cst_15 = arith.constant 5.000000e-01 : f32
      %16 = vector.broadcast %cst_15 : f32 to vector<16x256xf32>
      %17 = arith.mulf %16, %15 : vector<16x256xf32>
      %cst_16 = arith.constant 0.707106769 : f32
      %18 = vector.broadcast %cst_16 : f32 to vector<16x256xf32>
      %19 = arith.mulf %15, %18 : vector<16x256xf32>
      %20 = math.erf %19 : vector<16x256xf32>
      %cst_17 = arith.constant 1.000000e+00 : f32
      %21 = vector.broadcast %cst_17 : f32 to vector<16x256xf32>
      %22 = arith.addf %21, %20 : vector<16x256xf32>
      %23 = arith.mulf %17, %22 : vector<16x256xf32>
      %c0_18 = arith.constant 0 : index
      %c0_19 = arith.constant 0 : index
      %24 = vector.load %arg8[%c0_18, %c0_19] : memref<16x256xf32, #tpu.memory_space<vmem>>, vector<16x256xf32>
      tpu.vector_store %arg8[%c0_18, %c0_19], %23 {strides = array<i32>} : memref<16x256xf32, #tpu.memory_space<vmem>>, vector<16x256xf32>,
    } else {
    }
    %c0 = arith.constant 0 : index
    %c0_1 = arith.constant 0 : index
    %3 = vector.load %arg8[%c0, %c0_1] : memref<16x256xf32, #tpu.memory_space<vmem>>, vector<16x256xf32>
    %c0_2 = arith.constant 0 : index
    %c0_3 = arith.constant 0 : index
    %4 = vector.load %arg5[%c0_2, %c0_3] : memref<256x256xf32, #tpu.memory_space<vmem>>, vector<256x256xf32>
    %cst = arith.constant dense<0.000000e+00> : vector<16x256xf32>
    %5 = tpu.matmul %3, %4, %cst {dimension_numbers = #tpu.dot_dimension_numbers<[1], [0], [0], [1], [0, 0, 1, 1], [], []>} : vector<16x256xf32>, vector<256x256xf32>, vector<16x256xf32> -> vector<16x256xf32>
    %c0_4 = arith.constant 0 : index
    %c0_5 = arith.constant 0 : index
    %6 = vector.load %arg6[%c0_4, %c0_5] : memref<1x256xf32, #tpu.memory_space<vmem>>, vector<1x256xf32>
    %7 = vector.broadcast %6 : vector<1x256xf32> to vector<16x256xf32>
    %8 = arith.addf %5, %7 : vector<16x256xf32>
    %c0_6 = arith.constant 0 : index
    %c0_7 = arith.constant 0 : index
    %9 = vector.load %arg7[%c0_6, %c0_7] : memref<16x256xf32, #tpu.memory_space<vmem>>, vector<16x256xf32>
    tpu.vector_store %arg7[%c0_6, %c0_7], %8 {strides = array<i32>} : memref<16x256xf32, #tpu.memory_space<vmem>>, vector<16x256xf32>,
    return
  }
  func.func @transform_0(%arg0: i32, %arg1: i32) -> (i32, i32) {
    %c0_i32 = arith.constant 0 : i32
    %c0_i32_0 = arith.constant 0 : i32
    return %arg0, %c0_i32 : i32, i32
  }
  func.func @transform_1(%arg0: i32, %arg1: i32) -> (i32, i32) {
    %c0_i32 = arith.constant 0 : i32
    %c0_i32_0 = arith.constant 0 : i32
    %c0_i32_1 = arith.constant 0 : i32
    return %c0_i32, %c0_i32_0 : i32, i32
  }
  func.func @transform_2(%arg0: i32, %arg1: i32) -> (i32, i32) {
    %c0_i32 = arith.constant 0 : i32
    %c0_i32_0 = arith.constant 0 : i32
    %c0_i32_1 = arith.constant 0 : i32
    return %c0_i32, %c0_i32_0 : i32, i32
  }
  func.func @transform_3(%arg0: i32, %arg1: i32) -> (i32, i32) {
    %c0_i32 = arith.constant 0 : i32
    %c0_i32_0 = arith.constant 0 : i32
    return %c0_i32, %arg1 : i32, i32
  }
  func.func @transform_4(%arg0: i32, %arg1: i32) -> (i32, i32) {
    %c0_i32 = arith.constant 0 : i32
    %c0_i32_0 = arith.constant 0 : i32
    return %c0_i32, %arg1 : i32, i32
  }
  func.func @transform_5(%arg0: i32, %arg1: i32) -> (i32, i32) {
    %c0_i32 = arith.constant 0 : i32
    return %arg0, %arg1 : i32, i32
  }
}

</mosaic_0001>

<bundles_post_ra>
// kernel: image_adapter_forward.1
= control target key start
LH: loop header
LB: loop body
LE: loop exit
PB: predicated region body
PF: predicated region fallthrough
CT: control target
= control target key end

     0   :  { %10 = vsyncpa [#allocation4], 0  ;;  %s729_s0 = inlined_call_operand.hbm [shape: f32[16,256], index: 0, kind: input, shape index: {}]   ;;  %s730_s1 = inlined_call_operand.hbm [shape: f32[256,256], index: 1, kind: input, shape index: {}]   ;;  %s731_s2 = inlined_call_operand.vmem [shape: f32[1,256], index: 2, kind: input, shape index: {}]   ;;  %s732_s3 = inlined_call_operand.hbm [shape: f32[256,256], index: 3, kind: input, shape index: {}]   ;;  %s733_s4 = inlined_call_operand.vmem [shape: f32[1,256], index: 4, kind: input, shape index: {}]   ;;  %s734_s5 = inlined_call_operand.vmem [shape: f32[16,256], index: 5, kind: output, shape index: {}]  }
   0x1   :  { %11 = vsyncpa [#allocation6], 0  ;;  %s624_s18 = smov [#allocation5]   ;;  %s625_s20 = smov [#allocation3]  }
   0x2   :  { %s29_s19 = sshll.u32 %s624_s18, 4  ;;  %s17_s21 = sshll.u32 %s625_s20, 4  ;;  %s30_s19 = int_to_ptr.vmem [resolvable:$true] %s29_s19  ;;  %s659_s21 = int_to_ptr.vmem [resolvable:$true] %s17_s21 }
   0x3   :  { %s554_s24 = scalar_lea.hbm %s730_s1, 8192 }
   0x4   :  { %p555_p0 = scmp.ne.s32.totalorder %s730_s1, %s554_s24  ;;  %p558_p1 = scmp.lt.u32.totalorder %s554_s24, %s730_s1 }
   0x6   :  { %p560_p2 = pnand %p558_p1, %p555_p0 }
   0x8   :  { %563 = shalt.err (!%p560_p2)
}
   0x9   :  { %s564_s29 = scalar_lea.vmem %s30_s19, 8192  ;;  %p569_p4 = scmp.lt.s32.totalorder %s30_s19, %s30_s19 }
   0xa   :  { %p565_p3 = scmp.ne.s32.totalorder %s30_s19, %s564_s29  ;;  %p570_p5 = scmp.lt.s32.totalorder %s564_s29, %s564_s29 }
   0xc   :  { %p571_p6 = por %p570_p5, %p569_p4 }
   0xe   :  { %p572_p7 = pnand %p571_p6, %p565_p3 }
  0x10   :  { %575 = shalt.err (!%p572_p7)
}
  0x11   :  { %s626_s30 = smov 256   ;;  %s627_s6 = smov 16  }
  0x12   :  { %35 = dma.hbm_to_vmem [thread:$0]  %s730_s1, 8192, %s30_s19, [#allocation6], %s626_s30, %s626_s30, %s627_s6  }
  0x13   :  { %s576_s11 = scalar_lea.hbm %s729_s0, 512 }
  0x14   :  { %p577_p8 = scmp.ne.s32.totalorder %s729_s0, %s576_s11  ;;  %p580_p9 = scmp.lt.u32.totalorder %s576_s11, %s729_s0 }
  0x16   :  { %p582_p10 = pnand %p580_p9, %p577_p8 }
  0x18   :  { %585 = shalt.err (!%p582_p10)
}
  0x19   :  { %s586_s16 = scalar_lea.vmem %s659_s21, 512  ;;  %p591_p12 = scmp.lt.s32.totalorder %s659_s21, %s659_s21 }
  0x1a   :  { %p587_p11 = scmp.ne.s32.totalorder %s659_s21, %s586_s16  ;;  %p592_p13 = scmp.lt.s32.totalorder %s586_s16, %s586_s16 }
  0x1c   :  { %p593_p0 = por %p592_p13, %p591_p12 }
  0x1e   :  { %p594_p1 = pnand %p593_p0, %p587_p11 }
  0x20   :  { %597 = shalt.err (!%p594_p1)
}
  0x21   :  { %23 = dma.hbm_to_vmem [thread:$0]  %s729_s0, 512, %s659_s21, [#allocation4], %s626_s30, %s626_s30, %s627_s6  }
  0x22   :  { %s628_s18 = smov [#allocation7]   ;;  %s598_s23 = scalar_lea.hbm %s732_s3, 8192 }
  0x23   :  { %s43_s19 = sshll.u32 %s628_s18, 4  ;;  %p599_p2 = scmp.ne.s32.totalorder %s732_s3, %s598_s23  ;;  %s44_s19 = int_to_ptr.vmem [resolvable:$true] %s43_s19 }
  0x24   :  { %p602_p3 = scmp.lt.u32.totalorder %s598_s23, %s732_s3 }
  0x26   :  { %p604_p4 = pnand %p602_p3, %p599_p2 }
  0x28   :  { %607 = shalt.err (!%p604_p4)
}
  0x29   :  { %s608_s28 = scalar_lea.vmem %s44_s19, 8192  ;;  %p613_p6 = scmp.lt.s32.totalorder %s44_s19, %s44_s19 }
  0x2a   :  { %p609_p5 = scmp.ne.s32.totalorder %s44_s19, %s608_s28  ;;  %p614_p7 = scmp.lt.s32.totalorder %s608_s28, %s608_s28 }
  0x2c   :  { %p615_p8 = por %p614_p7, %p613_p6 }
  0x2e   :  { %p616_p9 = pnand %p615_p8, %p609_p5 }
  0x30   :  { %619 = shalt.err (!%p616_p9)
}
  0x31   :  { %49 = dma.hbm_to_vmem [thread:$0]  %s732_s3, 8192, %s44_s19, [#allocation6], %s626_s30, %s626_s30, %s627_s6  }
  0x32   :  { %620 = dma.done.wait [#allocation4], 512  }
  0x33   :  { %621 = vsyncadd [#allocation4], 4294966784 }
  0x34   :  { %622 = dma.done.wait [#allocation6], 16384  }
  0x35   :  { %623 = vsyncadd [#allocation6], 4294950912  ;;  %v70_v0 = vld [vmem:[#allocation5 + $0x8] sm:$0xff]  ;;  %v72_v1 = vld [vmem:[#allocation5 + $0x18] sm:$0xff] }
  0x36   :  { %v69_v2 = vld [vmem:[#allocation5] sm:$0xff]  ;;  %v413_v3 = vpack.c.bf16 %v72_v1, %v70_v0  ;;  %v71_v4 = vld [vmem:[#allocation5 + $0x10] sm:$0xff]  ;;  %v74_v5 = vld [vmem:[#allocation5 + $0x28] sm:$0xff] }
  0x37   :  { %v76_v6 = vld [vmem:[#allocation5 + $0x38] sm:$0xff]  ;;  %v415_v7 = vpack.c.bf16 %v71_v4, %v69_v2  ;;  %v73_v9 = vld [vmem:[#allocation5 + $0x20] sm:$0xff]  ;;  %v75_v10 = vld [vmem:[#allocation5 + $0x30] sm:$0xff] }
  0x38   :  { %v417_v8 = vpack.c.bf16 %v76_v6, %v74_v5  ;;  %v78_v11 = vld [vmem:[#allocation5 + $0x48] sm:$0xff]  ;;  %414 = vmatprep.subr.bf16.mxu0 %v413_v3  ;;  %v80_v12 = vld [vmem:[#allocation5 + $0x58] sm:$0xff]  ;;  %v419_v13 = vpack.c.bf16 %v75_v10, %v73_v9  ;;  %v77_v15 = vld [vmem:[#allocation5 + $0x40] sm:$0xff] }
  0x39   :  { %416 = vmatpush1.bf16.msra.mxu0 %v415_v7  ;;  %v421_v14 = vpack.c.bf16 %v80_v12, %v78_v11  ;;  %v79_v16 = vld [vmem:[#allocation5 + $0x50] sm:$0xff]  ;;  %v82_v17 = vld [vmem:[#allocation5 + $0x68] sm:$0xff]  ;;  %v84_v18 = vld [vmem:[#allocation5 + $0x78] sm:$0xff] }
  0x3a   :  { %418 = vmatprep.subr.bf16.mxu0 %v417_v8  ;;  %v423_v19 = vpack.c.bf16 %v79_v16, %v77_v15  ;;  %v425_v20 = vpack.c.bf16 %v84_v18, %v82_v17  ;;  %v81_v21 = vld [vmem:[#allocation5 + $0x60] sm:$0xff]  ;;  %v83_v22 = vld [vmem:[#allocation5 + $0x70] sm:$0xff]  ;;  %v86_v23 = vld [vmem:[#allocation5 + $0x88] sm:$0xff] }
  0x3b   :  { %v88_v24 = vld [vmem:[#allocation5 + $0x98] sm:$0xff]  ;;  %v427_v25 = vpack.c.bf16 %v83_v22, %v81_v21  ;;  %v85_v27 = vld [vmem:[#allocation5 + $0x80] sm:$0xff]  ;;  %v87_v28 = vld [vmem:[#allocation5 + $0x90] sm:$0xff] }
  0x3c   :  { %v429_v26 = vpack.c.bf16 %v88_v24, %v86_v23  ;;  %v90_v29 = vld [vmem:[#allocation5 + $0xa8] sm:$0xff]  ;;  %v92_v30 = vld [vmem:[#allocation5 + $0xb8] sm:$0xff]  ;;  %v431_v31 = vpack.c.bf16 %v87_v28, %v85_v27  ;;  %v89_v33 = vld [vmem:[#allocation5 + $0xa0] sm:$0xff] }
  0x3d   :  { %420 = vmatpush1.bf16.msra.mxu0 %v419_v13  ;;  %v433_v32 = vpack.c.bf16 %v92_v30, %v90_v29  ;;  %v91_v34 = vld [vmem:[#allocation5 + $0xb0] sm:$0xff]  ;;  %v94_v35 = vld [vmem:[#allocation5 + $0xc8] sm:$0xff]  ;;  %v96_v36 = vld [vmem:[#allocation5 + $0xd8] sm:$0xff] }
  0x3e   :  { %422 = vmatprep.subr.bf16.mxu0 %v421_v14  ;;  %v435_v37 = vpack.c.bf16 %v91_v34, %v89_v33  ;;  %v437_v38 = vpack.c.bf16 %v96_v36, %v94_v35  ;;  %v93_v39 = vld [vmem:[#allocation5 + $0xc0] sm:$0xff]  ;;  %v95_v40 = vld [vmem:[#allocation5 + $0xd0] sm:$0xff]  ;;  %v66_v41 = vld [vmem:[#allocation3 + $0x8] sm:$0xff] }
  0x3f   :  { %v98_v42 = vld [vmem:[#allocation5 + $0xe8] sm:$0xff]  ;;  %v100_v43 = vld [vmem:[#allocation5 + $0xf8] sm:$0xff]  ;;  %209 = vmatprep.mubr.f32.mxu0 %v66_v41  ;;  %v97_v45 = vld [vmem:[#allocation5 + $0xe0] sm:$0xff]  ;;  %v439_v50 = vpack.c.bf16 %v95_v40, %v93_v39 }
  0x40   :  { %v251_v44 = vld [vmem:[#allocation7 + $0x8] sm:$0xff]  ;;  %v99_v46 = vld [vmem:[#allocation5 + $0xf0] sm:$0xff]  ;;  %v253_v47 = vld [vmem:[#allocation7 + $0x18] sm:$0xff]  ;;  %v441_v56 = vpack.c.bf16 %v100_v43, %v98_v42 }
  0x41   :  { %424 = vmatpush1.bf16.msra.mxu0 %v423_v19  ;;  %v250_v48 = vld [vmem:[#allocation7] sm:$0xff]  ;;  %v252_v49 = vld [vmem:[#allocation7 + $0x10] sm:$0xff]  ;;  %v477_v51 = vpack.c.bf16 %v253_v47, %v251_v44  ;;  %v255_v53 = vld [vmem:[#allocation7 + $0x28] sm:$0xff]  ;;  %v443_v0 = vpack.c.bf16 %v99_v46, %v97_v45 }
  0x42   :  { %426 = vmatprep.subr.bf16.mxu0 %v425_v20  ;;  %v479_v52 = vpack.c.bf16 %v252_v49, %v250_v48  ;;  %v257_v54 = vld [vmem:[#allocation7 + $0x38] sm:$0xff]  ;;  %v254_v55 = vld [vmem:[#allocation7 + $0x20] sm:$0xff]  ;;  %v256_v58 = vld [vmem:[#allocation7 + $0x30] sm:$0xff] }
  0x43   :  { %v481_v57 = vpack.c.bf16 %v257_v54, %v255_v53  ;;  %v259_v59 = vld [vmem:[#allocation7 + $0x48] sm:$0xff]  ;;  %v261_v60 = vld [vmem:[#allocation7 + $0x58] sm:$0xff]  ;;  %478 = vmatprep.subr.bf16.mxu1 %v477_v51  ;;  %v483_v63 = vpack.c.bf16 %v256_v58, %v254_v55  ;;  %v101_v1 = vld [vmem:[#allocation5 + $0x100] sm:$0xff] }
  0x44   :  { %v102_v61 = vld [vmem:[#allocation5 + $0x108] sm:$0xff]  ;;  %v104_v62 = vld [vmem:[#allocation5 + $0x118] sm:$0xff]  ;;  %480 = vmatpush1.bf16.msra.mxu1 %v479_v52  ;;  %v485_v2 = vpack.c.bf16 %v261_v60, %v259_v59  ;;  %v258_v3 = vld [vmem:[#allocation7 + $0x40] sm:$0xff] }
  0x45   :  { %428 = vmatpush1.bf16.msra.mxu0 %v427_v25  ;;  %482 = vmatprep.subr.bf16.mxu1 %v481_v57  ;;  %v260_v4 = vld [vmem:[#allocation7 + $0x50] sm:$0xff]  ;;  %v445_v5 = vpack.c.bf16 %v104_v62, %v102_v61  ;;  %v263_v7 = vld [vmem:[#allocation7 + $0x68] sm:$0xff]  ;;  %v265_v8 = vld [vmem:[#allocation7 + $0x78] sm:$0xff] }
  0x46   :  { %430 = vmatprep.subr.bf16.mxu0 %v429_v26  ;;  %v103_v6 = vld [vmem:[#allocation5 + $0x110] sm:$0xff]  ;;  %v106_v9 = vld [vmem:[#allocation5 + $0x128] sm:$0xff]  ;;  %v108_v10 = vld [vmem:[#allocation5 + $0x138] sm:$0xff]  ;;  %v487_v11 = vpack.c.bf16 %v260_v4, %v258_v3  ;;  %v489_v14 = vpack.c.bf16 %v265_v8, %v263_v7 }
  0x47   :  { %v447_v12 = vpack.c.bf16 %v103_v6, %v101_v1  ;;  %v105_v13 = vld [vmem:[#allocation5 + $0x120] sm:$0xff]  ;;  %v264_v16 = vld [vmem:[#allocation7 + $0x70] sm:$0xff]  ;;  %v449_v17 = vpack.c.bf16 %v108_v10, %v106_v9  ;;  %v267_v19 = vld [vmem:[#allocation7 + $0x88] sm:$0xff] }
  0x48   :  { %484 = vmatpush1.bf16.msra.mxu1 %v483_v63  ;;  %v262_v15 = vld [vmem:[#allocation7 + $0x60] sm:$0xff]  ;;  %v107_v18 = vld [vmem:[#allocation5 + $0x130] sm:$0xff]  ;;  %v269_v20 = vld [vmem:[#allocation7 + $0x98] sm:$0xff] }
  0x49   :  { %432 = vmatpush1.bf16.msra.mxu0 %v431_v31  ;;  %486 = vmatprep.subr.bf16.mxu1 %v485_v2  ;;  %v110_v21 = vld [vmem:[#allocation5 + $0x148] sm:$0xff]  ;;  %v112_v22 = vld [vmem:[#allocation5 + $0x158] sm:$0xff]  ;;  %v491_v23 = vpack.c.bf16 %v264_v16, %v262_v15  ;;  %v451_v24 = vpack.c.bf16 %v107_v18, %v105_v13  ;;  %v109_v25 = vld [vmem:[#allocation5 + $0x140] sm:$0xff]  ;;  %v493_v26 = vpack.c.bf16 %v269_v20, %v267_v19 }
  0x4a   :  { %434 = vmatprep.subr.bf16.mxu0 %v433_v32  ;;  %v266_v27 = vld [vmem:[#allocation7 + $0x80] sm:$0xff]  ;;  %v268_v28 = vld [vmem:[#allocation7 + $0x90] sm:$0xff]  ;;  %v453_v29 = vpack.c.bf16 %v112_v22, %v110_v21  ;;  %v271_v31 = vld [vmem:[#allocation7 + $0xa8] sm:$0xff] }
  0x4b   :  { %v111_v30 = vld [vmem:[#allocation5 + $0x150] sm:$0xff]  ;;  %v273_v32 = vld [vmem:[#allocation7 + $0xb8] sm:$0xff]  ;;  %v114_v33 = vld [vmem:[#allocation5 + $0x168] sm:$0xff]  ;;  %v495_v35 = vpack.c.bf16 %v268_v28, %v266_v27 }
  0x4c   :  { %488 = vmatpush1.bf16.msra.mxu1 %v487_v11  ;;  %v116_v34 = vld [vmem:[#allocation5 + $0x178] sm:$0xff]  ;;  %v455_v36 = vpack.c.bf16 %v111_v30, %v109_v25  ;;  %v270_v39 = vld [vmem:[#allocation7 + $0xa0] sm:$0xff]  ;;  %v272_v40 = vld [vmem:[#allocation7 + $0xb0] sm:$0xff] }
  0x4d   :  { %436 = vmatpush1.bf16.msra.mxu0 %v435_v37  ;;  %490 = vmatprep.subr.bf16.mxu1 %v489_v14  ;;  %v113_v37 = vld [vmem:[#allocation5 + $0x160] sm:$0xff]  ;;  %v457_v41 = vpack.c.bf16 %v116_v34, %v114_v33  ;;  %v115_v42 = vld [vmem:[#allocation5 + $0x170] sm:$0xff]  ;;  %v275_v43 = vld [vmem:[#allocation7 + $0xc8] sm:$0xff]  ;;  %v499_v47 = vpack.c.bf16 %v272_v40, %v270_v39 }
  0x4e   :  { %438 = vmatprep.subr.bf16.mxu0 %v437_v38  ;;  %v497_v38 = vpack.c.bf16 %v273_v32, %v271_v31  ;;  %v277_v44 = vld [vmem:[#allocation7 + $0xd8] sm:$0xff]  ;;  %v118_v45 = vld [vmem:[#allocation5 + $0x188] sm:$0xff]  ;;  %v459_v48 = vpack.c.bf16 %v115_v42, %v113_v37  ;;  %v117_v49 = vld [vmem:[#allocation5 + $0x180] sm:$0xff] }
  0x4f   :  { %v120_v46 = vld [vmem:[#allocation5 + $0x198] sm:$0xff]  ;;  %v274_v51 = vld [vmem:[#allocation7 + $0xc0] sm:$0xff]  ;;  %v276_v52 = vld [vmem:[#allocation7 + $0xd0] sm:$0xff] }
  0x50   :  { %492 = vmatpush1.bf16.msra.mxu1 %v491_v23  ;;  %v461_v53 = vpack.c.bf16 %v120_v46, %v118_v45  ;;  %v119_v54 = vld [vmem:[#allocation5 + $0x190] sm:$0xff]  ;;  %v279_v55 = vld [vmem:[#allocation7 + $0xe8] sm:$0xff]  ;;  %v124_v58 = vld [vmem:[#allocation5 + $0x1b8] sm:$0xff]  ;;  %v503_v59 = vpack.c.bf16 %v276_v52, %v274_v51 }
  0x51   :  { %440 = vmatpush1.bf16.msra.mxu0 %v439_v50  ;;  %494 = vmatprep.subr.bf16.mxu1 %v493_v26  ;;  %v501_v50 = vpack.c.bf16 %v277_v44, %v275_v43  ;;  %v122_v57 = vld [vmem:[#allocation5 + $0x1a8] sm:$0xff]  ;;  %v463_v60 = vpack.c.bf16 %v119_v54, %v117_v49  ;;  %v121_v61 = vld [vmem:[#allocation5 + $0x1a0] sm:$0xff]  ;;  %v123_v2 = vld [vmem:[#allocation5 + $0x1b0] sm:$0xff] }
  0x52   :  { %442 = vmatprep.subr.bf16.mxu0 %v441_v56  ;;  %v281_v56 = vld [vmem:[#allocation7 + $0xf8] sm:$0xff]  ;;  %v278_v63 = vld [vmem:[#allocation7 + $0xe0] sm:$0xff]  ;;  %v465_v1 = vpack.c.bf16 %v124_v58, %v122_v57  ;;  %v283_v3 = vld [vmem:[#allocation7 + $0x108] sm:$0xff]  ;;  %v467_v8 = vpack.c.bf16 %v123_v2, %v121_v61 }
  0x53   :  { %v505_v62 = vpack.c.bf16 %v281_v56, %v279_v55  ;;  %v285_v4 = vld [vmem:[#allocation7 + $0x118] sm:$0xff]  ;;  %v125_v9 = vld [vmem:[#allocation5 + $0x1c0] sm:$0xff]  ;;  %v127_v14 = vld [vmem:[#allocation5 + $0x1d0] sm:$0xff] }
  0x54   :  { %496 = vmatpush1.bf16.msra.mxu1 %v495_v35  ;;  %v128_v6 = vld [vmem:[#allocation5 + $0x1d8] sm:$0xff]  ;;  %v509_v10 = vpack.c.bf16 %v285_v4, %v283_v3  ;;  %v282_v11 = vld [vmem:[#allocation7 + $0x100] sm:$0xff]  ;;  %v287_v15 = vld [vmem:[#allocation7 + $0x128] sm:$0xff]  ;;  %v471_v20 = vpack.c.bf16 %v127_v14, %v125_v9  ;;  %v135_v4 = vlaneseq }
  0x55   :  { %444 = vmatpush1.bf16.msra.mxu0 %v443_v0  ;;  %498 = vmatprep.subr.bf16.mxu1 %v497_v38  ;;  %v280_v0 = vld [vmem:[#allocation7 + $0xf0] sm:$0xff]  ;;  %v289_v16 = vld [vmem:[#allocation7 + $0x138] sm:$0xff]  ;;  %v129_v21 = vld [vmem:[#allocation5 + $0x1e0] sm:$0xff] }
  0x56   :  { %446 = vmatprep.subr.bf16.mxu0 %v445_v5  ;;  %v126_v5 = vld [vmem:[#allocation5 + $0x1c8] sm:$0xff]  ;;  %v507_v7 = vpack.c.bf16 %v280_v0, %v278_v63  ;;  %v132_v18 = vld [vmem:[#allocation5 + $0x1f8] sm:$0xff]  ;;  %v513_v22 = vpack.c.bf16 %v289_v16, %v287_v15  ;;  %v286_v23 = vld [vmem:[#allocation7 + $0x120] sm:$0xff] }
  0x57   :  { %v469_v13 = vpack.c.bf16 %v128_v6, %v126_v5  ;;  %v131_v26 = vld [vmem:[#allocation5 + $0x1f0] sm:$0xff]  ;;  %v291_v27 = vld [vmem:[#allocation7 + $0x148] sm:$0xff]  ;;  %v293_v28 = vld [vmem:[#allocation7 + $0x158] sm:$0xff]  ;;  %v136_v5 = vshrl.u32 %v135_v4, 7 }
  0x58   :  { %500 = vmatpush1.bf16.msra.mxu1 %v499_v47  ;;  %v475_v30 = vpack.c.bf16 %v131_v26, %v129_v21  ;;  %v517_v31 = vpack.c.bf16 %v293_v28, %v291_v27  ;;  %v290_v32 = vld [vmem:[#allocation7 + $0x140] sm:$0xff]  ;;  %v292_v33 = vld [vmem:[#allocation7 + $0x150] sm:$0xff]  ;;  %v295_v38 = vld [vmem:[#allocation7 + $0x168] sm:$0xff] }
  0x59   :  { %448 = vmatpush1.bf16.msra.mxu0 %v447_v12  ;;  %502 = vmatprep.subr.bf16.mxu1 %v501_v50  ;;  %v284_v12 = vld [vmem:[#allocation7 + $0x110] sm:$0xff]  ;;  %v519_v34 = vpack.c.bf16 %v292_v33, %v290_v32  ;;  %v65_v35 = vld [vmem:[#allocation3] sm:$0xff]  ;;  %v297_v39 = vld [vmem:[#allocation7 + $0x178] sm:$0xff]  ;;  %v137_v6 = vsub.s32 0, %v136_v5 }
  0x5a   :  { %450 = vmatprep.subr.bf16.mxu0 %v449_v17  ;;  %v130_v17 = vld [vmem:[#allocation5 + $0x1e8] sm:$0xff]  ;;  %v511_v19 = vpack.c.bf16 %v284_v12, %v282_v11  ;;  %v67_v37 = vld [vmem:[#allocation3 + $0x10] sm:$0xff]  ;;  %v521_v40 = vpack.c.bf16 %v297_v39, %v295_v38  ;;  %v301_v45 = vld [vmem:[#allocation7 + $0x198] sm:$0xff] }
  0x5b   :  { %v473_v25 = vpack.c.bf16 %v132_v18, %v130_v17  ;;  %v296_v42 = vld [vmem:[#allocation7 + $0x170] sm:$0xff]  ;;  %v299_v44 = vld [vmem:[#allocation7 + $0x188] sm:$0xff]  ;;  %v298_v47 = vld [vmem:[#allocation7 + $0x180] sm:$0xff] }
  0x5c   :  { %504 = vmatpush1.bf16.msra.mxu1 %v503_v59  ;;  %v525_v46 = vpack.c.bf16 %v301_v45, %v299_v44  ;;  %v303_v50 = vld [vmem:[#allocation7 + $0x1a8] sm:$0xff]  ;;  %v305_v51 = vld [vmem:[#allocation7 + $0x1b8] sm:$0xff]  ;;  %v304_v54 = vld [vmem:[#allocation7 + $0x1b0] sm:$0xff] }
  0x5d   :  { %452 = vmatpush1.bf16.msra.mxu0 %v451_v24  ;;  %506 = vmatprep.subr.bf16.mxu1 %v505_v62  ;;  %v288_v24 = vld [vmem:[#allocation7 + $0x130] sm:$0xff]  ;;  %v529_v52 = vpack.c.bf16 %v305_v51, %v303_v50  ;;  %v307_v56 = vld [vmem:[#allocation7 + $0x1c8] sm:$0xff]  ;;  %v309_v57 = vld [vmem:[#allocation7 + $0x1d8] sm:$0xff] }
  0x5e   :  { %454 = vmatprep.subr.bf16.mxu0 %v453_v29  ;;  %v515_v29 = vpack.c.bf16 %v288_v24, %v286_v23  ;;  %v533_v58 = vpack.c.bf16 %v309_v57, %v307_v56  ;;  %v306_v59 = vld [vmem:[#allocation7 + $0x1c0] sm:$0xff]  ;;  %v311_v62 = vld [vmem:[#allocation7 + $0x1e8] sm:$0xff]  ;;  %v313_v63 = vld [vmem:[#allocation7 + $0x1f8] sm:$0xff] }
  0x5f   :  { %v537_v0 = vpack.c.bf16 %v313_v63, %v311_v62  ;;  %v312_v2 = vld [vmem:[#allocation7 + $0x1f0] sm:$0xff]  ;;  %v314_v39 = vld [vmem:[%s733_s4] sm:$0x3] }
  0x60   :  { %508 = vmatpush1.bf16.msra.mxu1 %v507_v7  ;;  %v133_v7 = vld [vmem:[%s731_s2] sm:$0x3] }
  0x61   :  { %456 = vmatpush1.bf16.msra.mxu0 %v455_v36  ;;  %510 = vmatprep.subr.bf16.mxu1 %v509_v10  ;;  %v68_v36 = vld [vmem:[#allocation3 + $0x18] sm:$0xff]  ;;  %v138_v9 = vrot.slane %v133_v7, %v137_v6 }
  0x62   :  { %458 = vmatprep.subr.bf16.mxu0 %v457_v41  ;;  %v294_v41 = vld [vmem:[#allocation7 + $0x160] sm:$0xff] }
  0x63   :  { %v523_v43 = vpack.c.bf16 %v296_v42, %v294_v41 }
  0x64   :  { %512 = vmatpush1.bf16.msra.mxu1 %v511_v19 }
  0x65   :  { %460 = vmatpush1.bf16.msra.mxu0 %v459_v48  ;;  %514 = vmatprep.subr.bf16.mxu1 %v513_v22  ;;  %v300_v48 = vld [vmem:[#allocation7 + $0x190] sm:$0xff] }
  0x66   :  { %462 = vmatprep.subr.bf16.mxu0 %v461_v53  ;;  %v527_v49 = vpack.c.bf16 %v300_v48, %v298_v47  ;;  %v302_v53 = vld [vmem:[#allocation7 + $0x1a0] sm:$0xff] }
  0x67   :  { %v531_v55 = vpack.c.bf16 %v304_v54, %v302_v53 }
  0x68   :  { %516 = vmatpush1.bf16.msra.mxu1 %v515_v29 }
  0x69   :  { %464 = vmatpush1.bf16.msra.mxu0 %v463_v60  ;;  %518 = vmatprep.subr.bf16.mxu1 %v517_v31  ;;  %v308_v60 = vld [vmem:[#allocation7 + $0x1d0] sm:$0xff] }
  0x6a   :  { %466 = vmatprep.subr.bf16.mxu0 %v465_v1  ;;  %v535_v61 = vpack.c.bf16 %v308_v60, %v306_v59  ;;  %v310_v1 = vld [vmem:[#allocation7 + $0x1e0] sm:$0xff] }
  0x6b   :  { %v539_v3 = vpack.c.bf16 %v312_v2, %v310_v1 }
  0x6c   :  { %520 = vmatpush1.bf16.msra.mxu1 %v519_v34 }
  0x6d   :  { %468 = vmatpush1.bf16.msra.mxu0 %v467_v8  ;;  %522 = vmatprep.subr.bf16.mxu1 %v521_v40  ;;  %v141_v8 = vsub.s32 1, %v136_v5  ;;  %v319_v40 = vrot.slane %v314_v39, %v137_v6 }
  0x6e   :  { %470 = vmatprep.subr.bf16.mxu0 %v469_v13 }
  0x6f   :  { %v142_v10 = vrot.slane %v133_v7, %v141_v8  ;;  %v323_v41 = vrot.slane %v314_v39, %v141_v8 }
  0x70   :  { %524 = vmatpush1.bf16.msra.mxu1 %v523_v43 }
  0x71   :  { %472 = vmatpush1.bf16.msra.mxu0 %v471_v20  ;;  %526 = vmatprep.subr.bf16.mxu1 %v525_v46 }
  0x72   :  { %474 = vmatprep.subr.bf16.mxu0 %v473_v25 }
  0x74   :  { %528 = vmatpush1.bf16.msra.mxu1 %v527_v49 }
  0x75   :  { %476 = vmatpush1.bf16.msra.mxu0 %v475_v30  ;;  %530 = vmatprep.subr.bf16.mxu1 %v529_v52 }
  0x78   :  { %210 = vmatmul.mubr.f32.vlgmr.msra.gmra.mrb[0].mxu0 %v65_v35  ;;  %532 = vmatpush1.bf16.msra.mxu1 %v531_v55 }
  0x79   :  { %215 = vmatprep.mubr.f32.mxu0 %v68_v36  ;;  %534 = vmatprep.subr.bf16.mxu1 %v533_v58 }
  0x7c   :  { %216 = vmatmul.mubr.f32.gmra.mrb[2].mxu0 %v67_v37  ;;  %536 = vmatpush1.bf16.msra.mxu1 %v535_v61 }
  0x7d   :  { %538 = vmatprep.subr.bf16.mxu1 %v537_v0 }
  0x80   :  { %540 = vmatpush1.bf16.msra.mxu1 %v539_v3 }
 0x14b   :  { %v211_v11 = vpop.f32.mrb[0].mxu0 }
 0x14c   :  { %v212_v12 = vadd.f32 %v211_v11, %v138_v9  ;;  %v213_v13 = vpop.f32.mrb[1].mxu0 }
 0x14d   :  { %v214_v14 = vadd.f32 %v213_v13, %v142_v10 }
 0x14e   :  { %v226_v15 = vmul.f32 0.70710677, %v212_v12  ;;  %v222_v28 = vmul.f32 0.5, %v212_v12 }
 0x14f   :  { %v227_v16 = vmul.f32 0.70710677, %v214_v14  ;;  %v217_v17 = vpop.f32.mrb[2].mxu0  ;;  %v223_v26 = vmul.f32 0.5, %v214_v14 }
 0x150   :  { %546 = verf.f32 %v226_v15  ;;  %v218_v18 = vadd.f32 %v217_v17, %v138_v9  ;;  %v219_v19 = vpop.f32.mrb[3].mxu0 }
 0x151   :  { %548 = verf.f32 %v227_v16  ;;  %v220_v20 = vadd.f32 %v219_v19, %v142_v10 }
 0x152   :  { %v228_v21 = vmul.f32 0.70710677, %v218_v18  ;;  %v224_v36 = vmul.f32 0.5, %v218_v18 }
 0x153   :  { %v229_v22 = vmul.f32 0.70710677, %v220_v20  ;;  %v225_v34 = vmul.f32 0.5, %v220_v20 }
 0x154   :  { %550 = verf.f32 %v228_v21 }
 0x155   :  { %552 = verf.f32 %v229_v22 }
 0x15a   :  { %v547_v23 = vpop.eup %546 }
 0x15b   :  { %v549_v24 = vpop.eup %548  ;;  %v234_v25 = vadd.f32 1.0, %v547_v23 }
 0x15c   :  { %v235_v27 = vadd.f32 1.0, %v549_v24 }
 0x15d   :  { %v238_v33 = vmul.f32 %v234_v25, %v222_v28 }
 0x15e   :  { %v551_v29 = vpop.eup %550  ;;  %v239_v30 = vmul.f32 %v235_v27, %v223_v26 }
 0x15f   :  { %v553_v31 = vpop.eup %552  ;;  %v236_v32 = vadd.f32 1.0, %v551_v29 }
 0x160   :  { %v237_v35 = vadd.f32 1.0, %v553_v31  ;;  %390 = vmatprep.mubr.f32.mxu1 %v239_v30 }
 0x161   :  { %391 = vmatmul.mubr.f32.vlgmr.msra.gmra.mrb[0].mxu1 %v238_v33  ;;  %v240_v38 = vmul.f32 %v236_v32, %v224_v36 }
 0x162   :  { %v241_v37 = vmul.f32 %v237_v35, %v225_v34 }
 0x164   :  { %396 = vmatprep.mubr.f32.mxu1 %v241_v37 }
 0x165   :  { %397 = vmatmul.mubr.f32.gmra.mrb[2].mxu1 %v240_v38 }
 0x234   :  { %v392_v42 = vpop.f32.mrb[0].mxu1 }
 0x235   :  { %v393_v43 = vadd.f32 %v392_v42, %v319_v40  ;;  %v394_v44 = vpop.f32.mrb[1].mxu1 }
 0x236   :  { %v395_v45 = vadd.f32 %v394_v44, %v323_v41 }
 0x237   :  { %403 = vst [vmem:[%s734_s5] sm:$0xff] %v393_v43 }
 0x238   :  { %404 = vst [vmem:[%s734_s5 + $0x8] sm:$0xff] %v395_v45  ;;  %v398_v46 = vpop.f32.mrb[2].mxu1 }
 0x239   :  { %v399_v47 = vadd.f32 %v398_v46, %v319_v40  ;;  %v400_v48 = vpop.f32.mrb[3].mxu1 }
 0x23a   :  { %v401_v49 = vadd.f32 %v400_v48, %v323_v41 }
 0x23b   :  { %405 = vst [vmem:[%s734_s5 + $0x10] sm:$0xff] %v399_v47 }
 0x23c   :  { %406 = vst [vmem:[%s734_s5 + $0x18] sm:$0xff] %v401_v49 }
 0x23d   :  { %411 = vsyncpa [#allocation4], 1 }
 0x23e   :  { %412 = vsyncpa [#allocation6], 1 }

</bundles_post_ra>
